<compile_context>
chip_gen: v5e
topology: v5e:2x2
jax: 0.10.0
libtpu: 0.0.40
codegen_flags: <defaults>
</compile_context>

<pallas_src>
import functools

import jax
import jax.numpy as jnp
import numpy as np
from jax.experimental import pallas as pl
from jax.experimental.pallas import tpu as pltpu


def _gaussian_taps(kernel_size: int, sigma: float) -> np.ndarray:
    """1-D taps, same construction as GaussianBlur.forward (torch), in numpy."""
    k = np.arange(kernel_size, dtype=np.float32) - kernel_size // 2
    k = np.exp(-(k ** 2) / (2.0 * np.float32(sigma) ** 2))
    k = k / k.sum()
    return k.astype(np.float32)


def _vmem_capacity_bytes() -> int:
    """Physical VMEM of the current chip; conservative fallback if unknown."""
    try:
        info = pltpu.get_tpu_info()
        for attr in ("vmem_capacity_bytes", "vmem_size_bytes", "vmem_bytes"):
            v = getattr(info, attr, None)
            if v:
                return int(v)
    except Exception:
        pass
    return 64 * 1024 * 1024  # v7x-sized fallback, safe on every generation


def _pick_block_channels(nc: int, hw: int, elem_bytes: int, vmem_cap: int) -> int:
    """Channel-block size: multiple of 8 sublanes (or == nc when nc < 8),
    sized against a generation-aware VMEM budget, and capped so the grid has
    >= ~8 steps when the channel count allows it (pipeline depth + work for
    both v7x TensorCores)."""
    block_budget = max(vmem_cap // 16, 512 * 1024)
    max_cb_mem = max(1, block_budget // (hw * elem_bytes))
    if nc <= 8:
        return nc                       # block dim == full array dim
    cb = min(nc, max_cb_mem)
    cb = max(8, (cb // 8) * 8)          # sublane-dense
    if nc >= 64:                        # enough channels -> keep >= 8 grid steps
        cb = min(cb, max(8, ((nc // 8) // 8) * 8))
    return cb


def _gaussian_blur_kernel(wcol_ref, x_ref, o_ref, *, taps, ksize, pad, width):
    """One block of `cb` flattened planes.

    wcol_ref : VMEM (1, H*W) int32   column index (f mod W) per lane
    x_ref    : VMEM (cb, H*W)        input planes (flattened)
    o_ref    : VMEM (cb, H*W)        blurred output planes (flattened)
    """
    cb, hw = x_ref.shape
    x = x_ref[...].astype(jnp.float32)
    wcol = wcol_ref[...]
    lane = jax.lax.broadcasted_iota(jnp.int32, (1, hw), 1)

    # Per-lane f32 coefficient rows (tap * in-bounds mask), hoisted once per
    # block.  They realize the conv's zero padding: vertical validity is a
    # plain lane-index bound, horizontal validity is a bound on (f mod W).
    vcoef = [None] * ksize
    hcoef = [None] * ksize
    for t in range(ksize):
        d = t - pad
        if d == 0:
            continue
        if d > 0:
            vvalid = lane < (hw - d * width)
            hvalid = wcol < (width - d)
        else:
            vvalid = lane >= (-d * width)
            hvalid = wcol >= (-d)
        tap = jnp.float32(taps[t])
        zero = jnp.float32(0.0)
        vcoef[t] = jnp.where(vvalid, tap, zero)
        hcoef[t] = jnp.where(hvalid, tap, zero)

    # Vertical 5-tap pass: lane rolls by multiples of W (XLU slot).
    v = jnp.float32(taps[pad]) * x
    for t in range(ksize):
        d = t - pad
        if d == 0:
            continue
        rolled = pltpu.roll(x, shift=(-d * width) % hw, axis=1)
        v = v + vcoef[t] * rolled

    # Horizontal 5-tap pass: lane rolls by +/-1, +/-2 (wrap masked by hcoef).
    out = jnp.float32(taps[pad]) * v
    for t in range(ksize):
        d = t - pad
        if d == 0:
            continue
        rolled = pltpu.roll(v, shift=(-d) % hw, axis=1)
        out = out + hcoef[t] * rolled

    o_ref[...] = out.astype(o_ref.dtype)


def gaussian_blur(x, *, kernel_size: int = 5, sigma: float = 1.5):
    """x: (N, C, H, W) -> depthwise Gaussian blur, same as the torch module."""
    N, C, H, W = x.shape
    pad = kernel_size // 2
    taps = tuple(float(t) for t in _gaussian_taps(kernel_size, sigma))

    NC = N * C
    HW = H * W
    x_flat = x.reshape(NC, HW)                              # free view
    wcol = (jnp.arange(HW, dtype=jnp.int32) % jnp.int32(W)).reshape(1, HW)

    vmem_cap = _vmem_capacity_bytes()
    cb = _pick_block_channels(NC, HW, 4, vmem_cap)
    vmem_limit = min(int(vmem_cap * 3 // 4), 128 * 1024 * 1024)

    kernel = functools.partial(_gaussian_blur_kernel,
                               taps=taps, ksize=kernel_size, pad=pad, width=W)

    out_flat = pl.pallas_call(
        kernel,
        out_shape=jax.ShapeDtypeStruct((NC, HW), x.dtype),
        grid=(pl.cdiv(NC, cb),),
        in_specs=[
            pl.BlockSpec((1, HW), lambda i: (0, 0)),        # wcol, stays resident
            pl.BlockSpec((cb, HW), lambda i: (i, 0)),
        ],
        out_specs=pl.BlockSpec((cb, HW), lambda i: (i, 0)),
        compiler_params=pltpu.CompilerParams(
            dimension_semantics=("parallel",),
            vmem_limit_bytes=vmem_limit),
    )(wcol, x_flat)

    return out_flat.reshape(N, C, H, W)


def gaussian_blur_ref(x, *, kernel_size: int = 5, sigma: float = 1.5):
    """Pure-JAX reference mirroring F.conv2d(padding=k//2, groups=C)."""
    N, C, H, W = x.shape
    pad = kernel_size // 2
    k1d = jnp.asarray(_gaussian_taps(kernel_size, sigma))
    k2d = jnp.outer(k1d, k1d)
    filt = jnp.broadcast_to(k2d, (C, 1, kernel_size, kernel_size))
    return jax.lax.conv_general_dilated(
        x, filt, window_strides=(1, 1), padding=[(pad, pad), (pad, pad)],
        dimension_numbers=("NCHW", "OIHW", "NCHW"), feature_group_count=C)


if __name__ == "__main__":
    key = jax.random.PRNGKey(0)
    N, C, H, W = 2, 4, 16, 16
    x = jax.random.uniform(key, (N, C, H, W), dtype=jnp.float32)

    out = gaussian_blur(x, kernel_size=5, sigma=1.5)
    out = jax.block_until_ready(out)

    ref = gaussian_blur_ref(x, kernel_size=5, sigma=1.5)
    np.testing.assert_allclose(np.asarray(out), np.asarray(ref),
                               rtol=1e-5, atol=1e-5)
    print("KERNEL_OK")
</pallas_src>

<mosaic_0001>
module attributes {stable_mosaic.version = 11 : i64} {
  func.func @_gaussian_blur_kernel(%arg0: i32, %arg1: memref<1x256xi32, #tpu.memory_space<vmem>>, %arg2: memref<8x256xf32, #tpu.memory_space<vmem>>, %arg3: memref<8x256xf32, #tpu.memory_space<vmem>>) attributes {dimension_semantics = [#tpu.dimension_semantics<parallel>], iteration_bounds = array<i64: 1>, scalar_prefetch = 0 : i64, scratch_operands = 0 : i64, tpu.core_type = #tpu.core_type<tc>, window_params = [{pipeline_mode = #tpu.pipeline_mode<synchronous>, transform_indices = @transform_0, window_bounds = array<i64: 1, 256>}, {transform_indices = @transform_1, window_bounds = array<i64: 8, 256>}, {transform_indices = @transform_2, window_bounds = array<i64: 8, 256>}]} {
    %c0 = arith.constant 0 : index
    %c0_0 = arith.constant 0 : index
    %0 = vector.load %arg2[%c0, %c0_0] : memref<8x256xf32, #tpu.memory_space<vmem>>, vector<8x256xf32>
    %c0_1 = arith.constant 0 : index
    %c0_2 = arith.constant 0 : index
    %1 = vector.load %arg1[%c0_1, %c0_2] : memref<1x256xi32, #tpu.memory_space<vmem>>, vector<1x256xi32>
    %2 = tpu.iota {dimensions = array<i32: 1>} : vector<1x256xi32>
    %c32_i32 = arith.constant 32 : i32
    %3 = vector.broadcast %c32_i32 : i32 to vector<1x256xi32>
    %4 = arith.cmpi sge, %2, %3 : vector<1x256xi32>
    %c2_i32 = arith.constant 2 : i32
    %5 = vector.broadcast %c2_i32 : i32 to vector<1x256xi32>
    %6 = arith.cmpi sge, %1, %5 : vector<1x256xi32>
    %cst = arith.constant 0.120078392 : f32
    %cst_3 = arith.constant 0.000000e+00 : f32
    %7 = vector.broadcast %cst : f32 to vector<1x256xf32>
    %8 = vector.broadcast %cst_3 : f32 to vector<1x256xf32>
    %9 = arith.select %4, %7, %8 : vector<1x256xi1>, vector<1x256xf32>
    %cst_4 = arith.constant 0.120078392 : f32
    %cst_5 = arith.constant 0.000000e+00 : f32
    %10 = vector.broadcast %cst_4 : f32 to vector<1x256xf32>
    %11 = vector.broadcast %cst_5 : f32 to vector<1x256xf32>
    %12 = arith.select %6, %10, %11 : vector<1x256xi1>, vector<1x256xf32>
    %c16_i32 = arith.constant 16 : i32
    %13 = vector.broadcast %c16_i32 : i32 to vector<1x256xi32>
    %14 = arith.cmpi sge, %2, %13 : vector<1x256xi32>
    %c1_i32 = arith.constant 1 : i32
    %15 = vector.broadcast %c1_i32 : i32 to vector<1x256xi32>
    %16 = arith.cmpi sge, %1, %15 : vector<1x256xi32>
    %cst_6 = arith.constant 0.233880743 : f32
    %cst_7 = arith.constant 0.000000e+00 : f32
    %17 = vector.broadcast %cst_6 : f32 to vector<1x256xf32>
    %18 = vector.broadcast %cst_7 : f32 to vector<1x256xf32>
    %19 = arith.select %14, %17, %18 : vector<1x256xi1>, vector<1x256xf32>
    %cst_8 = arith.constant 0.233880743 : f32
    %cst_9 = arith.constant 0.000000e+00 : f32
    %20 = vector.broadcast %cst_8 : f32 to vector<1x256xf32>
    %21 = vector.broadcast %cst_9 : f32 to vector<1x256xf32>
    %22 = arith.select %16, %20, %21 : vector<1x256xi1>, vector<1x256xf32>
    %c240_i32 = arith.constant 240 : i32
    %23 = vector.broadcast %c240_i32 : i32 to vector<1x256xi32>
    %24 = arith.cmpi slt, %2, %23 : vector<1x256xi32>
    %c15_i32 = arith.constant 15 : i32
    %25 = vector.broadcast %c15_i32 : i32 to vector<1x256xi32>
    %26 = arith.cmpi slt, %1, %25 : vector<1x256xi32>
    %cst_10 = arith.constant 0.233880743 : f32
    %cst_11 = arith.constant 0.000000e+00 : f32
    %27 = vector.broadcast %cst_10 : f32 to vector<1x256xf32>
    %28 = vector.broadcast %cst_11 : f32 to vector<1x256xf32>
    %29 = arith.select %24, %27, %28 : vector<1x256xi1>, vector<1x256xf32>
    %cst_12 = arith.constant 0.233880743 : f32
    %cst_13 = arith.constant 0.000000e+00 : f32
    %30 = vector.broadcast %cst_12 : f32 to vector<1x256xf32>
    %31 = vector.broadcast %cst_13 : f32 to vector<1x256xf32>
    %32 = arith.select %26, %30, %31 : vector<1x256xi1>, vector<1x256xf32>
    %c224_i32 = arith.constant 224 : i32
    %33 = vector.broadcast %c224_i32 : i32 to vector<1x256xi32>
    %34 = arith.cmpi slt, %2, %33 : vector<1x256xi32>
    %c14_i32 = arith.constant 14 : i32
    %35 = vector.broadcast %c14_i32 : i32 to vector<1x256xi32>
    %36 = arith.cmpi slt, %1, %35 : vector<1x256xi32>
    %cst_14 = arith.constant 0.120078392 : f32
    %cst_15 = arith.constant 0.000000e+00 : f32
    %37 = vector.broadcast %cst_14 : f32 to vector<1x256xf32>
    %38 = vector.broadcast %cst_15 : f32 to vector<1x256xf32>
    %39 = arith.select %34, %37, %38 : vector<1x256xi1>, vector<1x256xf32>
    %cst_16 = arith.constant 0.120078392 : f32
    %cst_17 = arith.constant 0.000000e+00 : f32
    %40 = vector.broadcast %cst_16 : f32 to vector<1x256xf32>
    %41 = vector.broadcast %cst_17 : f32 to vector<1x256xf32>
    %42 = arith.select %36, %40, %41 : vector<1x256xi1>, vector<1x256xf32>
    %cst_18 = arith.constant 0.292081714 : f32
    %43 = vector.broadcast %cst_18 : f32 to vector<8x256xf32>
    %44 = arith.mulf %43, %0 : vector<8x256xf32>
    %c32_i32_19 = arith.constant 32 : i32
    %45 = tpu.dynamic_rotate %0 by %c32_i32_19 dim 1 : vector<8x256xf32>, i32 -> vector<8x256xf32>
    %46 = vector.broadcast %9 : vector<1x256xf32> to vector<8x256xf32>
    %47 = arith.mulf %46, %45 : vector<8x256xf32>
    %48 = arith.addf %44, %47 : vector<8x256xf32>
    %c16_i32_20 = arith.constant 16 : i32
    %49 = tpu.dynamic_rotate %0 by %c16_i32_20 dim 1 : vector<8x256xf32>, i32 -> vector<8x256xf32>
    %50 = vector.broadcast %19 : vector<1x256xf32> to vector<8x256xf32>
    %51 = arith.mulf %50, %49 : vector<8x256xf32>
    %52 = arith.addf %48, %51 : vector<8x256xf32>
    %c240_i32_21 = arith.constant 240 : i32
    %53 = tpu.dynamic_rotate %0 by %c240_i32_21 dim 1 : vector<8x256xf32>, i32 -> vector<8x256xf32>
    %54 = vector.broadcast %29 : vector<1x256xf32> to vector<8x256xf32>
    %55 = arith.mulf %54, %53 : vector<8x256xf32>
    %56 = arith.addf %52, %55 : vector<8x256xf32>
    %c224_i32_22 = arith.constant 224 : i32
    %57 = tpu.dynamic_rotate %0 by %c224_i32_22 dim 1 : vector<8x256xf32>, i32 -> vector<8x256xf32>
    %58 = vector.broadcast %39 : vector<1x256xf32> to vector<8x256xf32>
    %59 = arith.mulf %58, %57 : vector<8x256xf32>
    %60 = arith.addf %56, %59 : vector<8x256xf32>
    %cst_23 = arith.constant 0.292081714 : f32
    %61 = vector.broadcast %cst_23 : f32 to vector<8x256xf32>
    %62 = arith.mulf %61, %60 : vector<8x256xf32>
    %c2_i32_24 = arith.constant 2 : i32
    %63 = tpu.dynamic_rotate %60 by %c2_i32_24 dim 1 : vector<8x256xf32>, i32 -> vector<8x256xf32>
    %64 = vector.broadcast %12 : vector<1x256xf32> to vector<8x256xf32>
    %65 = arith.mulf %64, %63 : vector<8x256xf32>
    %66 = arith.addf %62, %65 : vector<8x256xf32>
    %c1_i32_25 = arith.constant 1 : i32
    %67 = tpu.dynamic_rotate %60 by %c1_i32_25 dim 1 : vector<8x256xf32>, i32 -> vector<8x256xf32>
    %68 = vector.broadcast %22 : vector<1x256xf32> to vector<8x256xf32>
    %69 = arith.mulf %68, %67 : vector<8x256xf32>
    %70 = arith.addf %66, %69 : vector<8x256xf32>
    %c255_i32 = arith.constant 255 : i32
    %71 = tpu.dynamic_rotate %60 by %c255_i32 dim 1 : vector<8x256xf32>, i32 -> vector<8x256xf32>
    %72 = vector.broadcast %32 : vector<1x256xf32> to vector<8x256xf32>
    %73 = arith.mulf %72, %71 : vector<8x256xf32>
    %74 = arith.addf %70, %73 : vector<8x256xf32>
    %c254_i32 = arith.constant 254 : i32
    %75 = tpu.dynamic_rotate %60 by %c254_i32 dim 1 : vector<8x256xf32>, i32 -> vector<8x256xf32>
    %76 = vector.broadcast %42 : vector<1x256xf32> to vector<8x256xf32>
    %77 = arith.mulf %76, %75 : vector<8x256xf32>
    %78 = arith.addf %74, %77 : vector<8x256xf32>
    %c0_26 = arith.constant 0 : index
    %c0_27 = arith.constant 0 : index
    %79 = vector.load %arg3[%c0_26, %c0_27] : memref<8x256xf32, #tpu.memory_space<vmem>>, vector<8x256xf32>
    tpu.vector_store %arg3[%c0_26, %c0_27], %78 {strides = array<i32>} : memref<8x256xf32, #tpu.memory_space<vmem>>, vector<8x256xf32>,
    return
  }
  func.func @transform_0(%arg0: i32) -> (i32, i32) {
    %c0_i32 = arith.constant 0 : i32
    %c0_i32_0 = arith.constant 0 : i32
    %c0_i32_1 = arith.constant 0 : i32
    return %c0_i32, %c0_i32_0 : i32, i32
  }
  func.func @transform_1(%arg0: i32) -> (i32, i32) {
    %c0_i32 = arith.constant 0 : i32
    %c0_i32_0 = arith.constant 0 : i32
    return %arg0, %c0_i32 : i32, i32
  }
  func.func @transform_2(%arg0: i32) -> (i32, i32) {
    %c0_i32 = arith.constant 0 : i32
    %c0_i32_0 = arith.constant 0 : i32
    return %arg0, %c0_i32 : i32, i32
  }
}

</mosaic_0001>

<bundles_post_ra>
// kernel: tpu_custom_call.1
= control target key start
LH: loop header
LB: loop body
LE: loop exit
PB: predicated region body
PF: predicated region fallthrough
CT: control target
= control target key end

     0   :  { %7 = vsyncpa [#allocation3], 0  ;;  %s349_s0 = inlined_call_operand.hbm [shape: s32[1,256], index: 0, kind: input, shape index: {}]   ;;  %s350_s1 = inlined_call_operand.hbm [shape: f32[8,256], index: 1, kind: input, shape index: {}]   ;;  %s351_s2 = inlined_call_operand.hbm [shape: f32[8,256], index: 2, kind: output, shape index: {}]  }
   0x1   :  { %8 = vsyncpa [#allocation6], 0 }
   0x2   :  { %9 = vsyncpa [#allocation4], 0  ;;  %s15_s11 = sshll.u32 %s349_s0, 4  ;;  %s292_s12 = smov [#allocation2]   ;;  %s16_s11 = int_to_ptr.hbm [resolvable:$true] %s15_s11 }
   0x3   :  { %s17_s13 = sshll.u32 %s292_s12, 4  ;;  %s26_s16 = sshll.u32 %s350_s1, 4  ;;  %s18_s13 = int_to_ptr.vmem [resolvable:$true] %s17_s13  ;;  %s27_s16 = int_to_ptr.hbm [resolvable:$true] %s26_s16 }
   0x4   :  { %20 = dma.hbm_to_vmem [thread:$0]  %s16_s11, 32, %s18_s13, [#allocation3]  }
   0x5   :  { %s293_s17 = smov [#allocation5]  }
   0x6   :  { %s28_s18 = sshll.u32 %s293_s17, 4  ;;  %s29_s18 = int_to_ptr.vmem [resolvable:$true] %s28_s18 }
   0x7   :  { %31 = dma.hbm_to_vmem [thread:$0]  %s27_s16, 256, %s29_s18, [#allocation6]  }
   0x8   :  { %286 = dma.done.wait [#allocation3], 32  }
   0x9   :  { %287 = vsyncadd [#allocation3], 4294967264 }
   0xa   :  { %288 = dma.done.wait [#allocation6], 256  }
   0xb   :  { %289 = vsyncadd [#allocation6], 4294967040  ;;  %v40_v0 = vld [vmem:[#allocation5] sm:$0xff]  ;;  %s294_s0 = smov 16   ;;  %s295_s19 = smov 32   ;;  %v41_v1 = vld [vmem:[#allocation5 + $0x8] sm:$0xff]  ;;  %v43_v2 = vlaneseq }
   0xc   :  { %83 = vrot.lane.b32.xlu1 %v40_v0, %s294_s0  ;;  %72 = vrot.lane.b32.xlu0 %v40_v0, %s295_s19  ;;  %s296_s20 = smov 112   ;;  %s297_s1 = smov 96   ;;  %v298_v8 = vmov 0.0   ;;  %v71_v12 = vmul.f32 0.2920817, %v41_v1 }
   0xd   :  { %94 = vrot.lane.b32.xlu2 %v40_v0, %s296_s20  ;;  %v325_v6 = vand.u32 127, %v43_v2  ;;  %v70_v14 = vmul.f32 0.2920817, %v40_v0  ;;  %s299_s21 = smov 2   ;;  %s300_s22 = smov 1  }
   0xe   :  { %s301_s23 = smov 127   ;;  %s302_s24 = smov 126   ;;  %v42_v44 = vld [vmem:[#allocation2] sm:$0x3] }
   0xf   :  { %vm46_vm0 = vcmp.ge.s32.totalorder %v325_v6, 32  ;;  %vm52_vm1 = vcmp.ge.s32.totalorder %v325_v6, 16  ;;  %v45_v7 = vadd.s32 128, %v325_v6  ;;  %vm87_vm2 = vcmp.lt.s32.totalorder %v325_v6, 16  ;;  %s303_s25 = smov [#allocation7]   ;;  %s191_s29 = sshll.u32 %s351_s2, 4  ;;  %s192_s29 = int_to_ptr.hbm [resolvable:$true] %s191_s29 }
  0x10   :  { %vm76_vm3 = vcmp.lt.s32.totalorder %v325_v6, 32  ;;  %v49_v9 = vsel %vm46_vm0, 0.12007839, %v298_v8  ;;  %v55_v10 = vsel %vm52_vm1, 0.23388074, %v298_v8  ;;  %vm98_vm5 = vcmp.lt.s32.totalorder %v325_v6, 112 }
  0x11   :  { %vm59_vm4 = vcmp.lt.s32.totalorder %v45_v7, 240  ;;  %vm65_vm6 = vcmp.lt.s32.totalorder %v45_v7, 224  ;;  %vm109_vm7 = vcmp.lt.s32.totalorder %v325_v6, 96  ;;  %vm48_vm8 = vcmp.ge.s32.totalorder %v42_v44, 2  ;;  %s189_s26 = sshll.u32 %s303_s25, 4  ;;  %s190_s26 = int_to_ptr.vmem [resolvable:$true] %s189_s26 }
  0x12   :  { %v62_v26 = vsel %vm59_vm4, 0.23388074, %v298_v8  ;;  %v68_v31 = vsel %vm65_vm6, 0.12007839, %v298_v8  ;;  %v51_v48 = vsel %vm48_vm8, 0.12007839, %v298_v8 }
  0x13   :  { %vm122_vm9 = vcmp.lt.s32.totalorder %v325_v6, 2  ;;  %vm54_vm10 = vcmp.ge.s32.totalorder %v42_v44, 1  ;;  %v126_v49 = vperm.slane %v51_v48, 0  ;;  %v127_v50 = vperm.slane %v51_v48, 1 }
  0x14   :  { %85 = vrot.lane.b32.xlu1 %v41_v1, %s294_s0  ;;  %74 = vrot.lane.b32.xlu0 %v41_v1, %s295_s19  ;;  %vm60_vm11 = vcmp.lt.s32.totalorder %v42_v44, 15  ;;  %v57_v54 = vsel %vm54_vm10, 0.23388074, %v298_v8  ;;  %vm66_vm12 = vcmp.lt.s32.totalorder %v42_v44, 14  ;;  %vm138_vm13 = vcmp.lt.s32.totalorder %v325_v6, 1 }
  0x15   :  { %96 = vrot.lane.b32.xlu2 %v41_v1, %s296_s20  ;;  %v63_v55 = vsel %vm60_vm11, 0.23388074, %v298_v8  ;;  %vm154_vm14 = vcmp.lt.s32.totalorder %v325_v6, 127  ;;  %v142_v62 = vperm.slane %v57_v54, 0  ;;  %v143_v63 = vperm.slane %v57_v54, 1 }
  0x16   :  { %v69_v2 = vsel %vm66_vm12, 0.12007839, %v298_v8  ;;  %vm170_vm15 = vcmp.lt.s32.totalorder %v325_v6, 126 }
  0x1c   :  { %107 = vrot.lane.b32.xlu1 %v41_v1, %s297_s1  ;;  %105 = vrot.lane.b32.xlu0 %v40_v0, %s297_s1  ;;  %v158_v0 = vperm.slane %v63_v55, 0  ;;  %v159_v1 = vperm.slane %v63_v55, 1 }
  0x67   :  { %v95_v3 = vpop.permute.xlu2 %94 }
  0x6f   :  { %v97_v19 = vpop.permute.xlu2 %96 }
  0x70   :  { %v99_v27 = vsel %vm98_vm5, %v95_v3, %v97_v19  ;;  %v100_v28 = vsel %vm98_vm5, %v97_v19, %v95_v3 }
  0x71   :  { %v101_v32 = vmul.f32 0.23388074, %v99_v27  ;;  %v102_v33 = vmul.f32 %v100_v28, %v62_v26 }
  0x7e   :  { %v84_v4 = vpop.permute.xlu1 %83  ;;  %v73_v5 = vpop.permute.xlu0 %72 }
  0x86   :  { %v86_v11 = vpop.permute.xlu1 %85  ;;  %v75_v13 = vpop.permute.xlu0 %74 }
  0x87   :  { %v88_v15 = vsel %vm87_vm2, %v84_v4, %v86_v11  ;;  %v89_v16 = vsel %vm87_vm2, %v86_v11, %v84_v4  ;;  %v77_v17 = vsel %vm76_vm3, %v73_v5, %v75_v13  ;;  %v78_v18 = vsel %vm76_vm3, %v75_v13, %v73_v5 }
  0x88   :  { %v79_v20 = vmul.f32 %v78_v18, %v49_v9  ;;  %v80_v21 = vmul.f32 0.12007839, %v77_v17  ;;  %v90_v22 = vmul.f32 %v89_v16, %v55_v10  ;;  %v91_v23 = vmul.f32 0.23388074, %v88_v15 }
  0x89   :  { %v174_v11 = vperm.slane %v69_v2, 0 }
  0x8a   :  { %v81_v24 = vadd.f32 %v79_v20, %v70_v14  ;;  %v82_v25 = vadd.f32 %v80_v21, %v71_v12  ;;  %v175_v12 = vperm.slane %v69_v2, 1 }
  0x8c   :  { %v92_v29 = vadd.f32 %v90_v22, %v81_v24  ;;  %v93_v30 = vadd.f32 %v91_v23, %v82_v25 }
  0x8e   :  { %v108_v34 = vpop.permute.xlu1 %107  ;;  %v106_v35 = vpop.permute.xlu0 %105  ;;  %v104_v38 = vadd.f32 %v102_v33, %v93_v30  ;;  %v103_v39 = vadd.f32 %v101_v32, %v92_v29 }
  0x8f   :  { %v110_v36 = vsel %vm109_vm7, %v106_v35, %v108_v34  ;;  %v111_v37 = vsel %vm109_vm7, %v108_v34, %v106_v35 }
  0x90   :  { %v112_v40 = vmul.f32 0.12007839, %v110_v36  ;;  %v113_v41 = vmul.f32 %v111_v37, %v68_v31 }
  0x92   :  { %v114_v42 = vadd.f32 %v112_v40, %v103_v39  ;;  %v115_v43 = vadd.f32 %v113_v41, %v104_v38 }
  0x94   :  { %120 = vrot.lane.b32.xlu0 %v115_v43, %s299_s21  ;;  %134 = vrot.lane.b32.xlu1 %v114_v42, %s300_s22  ;;  %v116_v60 = vmul.f32 0.2920817, %v114_v42  ;;  %v117_v61 = vmul.f32 0.2920817, %v115_v43 }
  0x95   :  { %118 = vrot.lane.b32.xlu2 %v114_v42, %s299_s21 }
  0x9c   :  { %150 = vrot.lane.b32.xlu0 %v114_v42, %s301_s23  ;;  %152 = vrot.lane.b32.xlu1 %v115_v43, %s301_s23 }
  0x9d   :  { %136 = vrot.lane.b32.xlu2 %v115_v43, %s300_s22 }
  0xa4   :  { %168 = vrot.lane.b32.xlu0 %v115_v43, %s302_s24 }
  0xa5   :  { %166 = vrot.lane.b32.xlu2 %v114_v42, %s302_s24 }
  0xef   :  { %v119_v45 = vpop.permute.xlu2 %118 }
  0xf7   :  { %v137_v53 = vpop.permute.xlu2 %136 }
  0xff   :  { %v167_v17 = vpop.permute.xlu2 %166 }
 0x106   :  { %v121_v46 = vpop.permute.xlu0 %120  ;;  %v135_v47 = vpop.permute.xlu1 %134 }
 0x107   :  { %v123_v51 = vsel %vm122_vm9, %v119_v45, %v121_v46  ;;  %v124_v52 = vsel %vm122_vm9, %v121_v46, %v119_v45  ;;  %v139_v3 = vsel %vm138_vm13, %v135_v47, %v137_v53  ;;  %v140_v4 = vsel %vm138_vm13, %v137_v53, %v135_v47 }
 0x108   :  { %v130_v56 = vmul.f32 %v126_v49, %v124_v52  ;;  %v131_v57 = vmul.f32 %v127_v50, %v123_v51  ;;  %v146_v13 = vmul.f32 %v142_v62, %v140_v4  ;;  %v147_v14 = vmul.f32 %v143_v63, %v139_v3 }
 0x10a   :  { %v132_v9 = vadd.f32 %v130_v56, %v116_v60  ;;  %v133_v10 = vadd.f32 %v131_v57, %v117_v61 }
 0x10c   :  { %v148_v18 = vadd.f32 %v146_v13, %v132_v9  ;;  %v149_v19 = vadd.f32 %v147_v14, %v133_v10 }
 0x10e   :  { %v151_v58 = vpop.permute.xlu0 %150  ;;  %v153_v59 = vpop.permute.xlu1 %152 }
 0x10f   :  { %v155_v5 = vsel %vm154_vm14, %v151_v58, %v153_v59  ;;  %v156_v7 = vsel %vm154_vm14, %v153_v59, %v151_v58 }
 0x110   :  { %v162_v15 = vmul.f32 %v158_v0, %v155_v5  ;;  %v163_v16 = vmul.f32 %v159_v1, %v156_v7 }
 0x112   :  { %v164_v22 = vadd.f32 %v162_v15, %v148_v18  ;;  %v165_v23 = vadd.f32 %v163_v16, %v149_v19 }
 0x116   :  { %v169_v20 = vpop.permute.xlu0 %168 }
 0x117   :  { %v171_v21 = vsel %vm170_vm15, %v167_v17, %v169_v20  ;;  %v172_v8 = vsel %vm170_vm15, %v169_v20, %v167_v17 }
 0x118   :  { %v178_v24 = vmul.f32 %v174_v11, %v171_v21  ;;  %v179_v25 = vmul.f32 %v175_v12, %v172_v8 }
 0x11a   :  { %v180_v6 = vadd.f32 %v178_v24, %v164_v22  ;;  %v181_v26 = vadd.f32 %v179_v25, %v165_v23 }
 0x11c   :  { %182 = vst [vmem:[#allocation7] sm:$0xff] %v180_v6 }
 0x11d   :  { %183 = vst [vmem:[#allocation7 + $0x8] sm:$0xff] %v181_v26 }
 0x11e   :  { %194 = dma.vmem_to_hbm [thread:$0]  %s190_s26, 256, %s192_s29, [#allocation4]  }
 0x11f   :  { %290 = dma.done.wait [#allocation4], 256  }
 0x120   :  { %291 = vsyncadd [#allocation4], 4294967040 }
 0x121   :  { %199 = vsyncpa [#allocation3], 1 }
 0x122   :  { %200 = vsyncpa [#allocation6], 1 }
 0x123   :  { %201 = vsyncpa [#allocation4], 1 }

</bundles_post_ra>
